<compile_context>
chip_gen: v7x
topology: tpu7x:2x2x1
jax: 0.10.0
libtpu: 0.0.40
codegen_flags: <defaults>
</compile_context>

<pallas_src>
import math

import jax
import jax.numpy as jnp
from jax.experimental import pallas as pl
from jax.experimental.pallas import tpu as pltpu


def _minor_transpose_kernel(x_ref, o_ref):
    # x_ref block: (ta, tm, tb), o_ref block: (ta, tb, tm).
    # ta is a small static batch; unrolled 2-D minor transposes lower cleanly.
    for i in range(x_ref.shape[0]):
        o_ref[i, :, :] = x_ref[i, :, :].T


def _pick_tile(dim):
    """Tile a dim with a 128-aligned divisor, else use the full dim (always legal)."""
    if dim <= 512:
        return dim
    for t in (512, 384, 256, 128):
        if dim % t == 0:
            return t
    # TODO(synk): use cdiv grids with masked edge tiles for very large dims that
    # are not 128-divisible instead of a full-dim block.
    return dim


def _batched_minor_transpose(x3):
    """x3: (A, M, B) row-major  ->  (A, B, M)  (i.e. moveaxis(x3, 1, -1))."""
    A, M, B = (int(d) for d in x3.shape)
    itemsize = int(x3.dtype.itemsize)

    tm = _pick_tile(M)   # full M or multiple of 128 -> legal as sublane & lane block
    tb = _pick_tile(B)   # full B or multiple of 128 -> legal as lane & sublane block

    # Batch the leading dim to amortize per-grid-step overhead, keeping the
    # in-kernel unroll and the per-buffer VMEM footprint small.
    budget = 2 * 1024 * 1024  # bytes per block buffer
    ta = 1
    for cand in range(min(A, 8), 0, -1):
        if A % cand == 0 and cand * tm * tb * itemsize <= budget:
            ta = cand
            break

    block_bytes = ta * tm * tb * itemsize
    # in + out blocks, double-buffered, plus slack; clamped for v7x (64 MiB phys).
    vmem_limit = int(min(max(4 * block_bytes + (4 << 20), 32 << 20), 48 << 20))

    grid = (A // ta, M // tm, B // tb)

    return pl.pallas_call(
        _minor_transpose_kernel,
        out_shape=jax.ShapeDtypeStruct((A, B, M), x3.dtype),
        grid=grid,
        in_specs=[pl.BlockSpec((ta, tm, tb), lambda a, i, j: (a, i, j))],
        out_specs=pl.BlockSpec((ta, tb, tm), lambda a, i, j: (a, j, i)),
        compiler_params=pltpu.CompilerParams(
            dimension_semantics=("parallel", "parallel", "parallel"),
            vmem_limit_bytes=vmem_limit),
        cost_estimate=pl.CostEstimate(
            flops=0, transcendentals=0,
            bytes_accessed=2 * int(x3.size) * itemsize),
    )(x3)


def transpose_pallas(x, perm=None):
    """Pallas equivalent of onnx2pytorch Transpose.forward."""
    n = x.ndim

    if perm is None or len(perm) == 0:
        dims_raw = tuple(reversed(range(n)))
    else:
        dims_raw = tuple(int(d) for d in perm)

    # onnx2pytorch quirk (checked on the raw dims, exactly like the module).
    if len(dims_raw) == 2 and dims_raw[0] == 1:
        return x

    dims = tuple(d % n for d in dims_raw)
    if n <= 1 or dims == tuple(range(n)):
        return x

    out_shape = tuple(x.shape[d] for d in dims)

    # ---- Reduce the permutation: drop size-1 axes ----------------------------
    keep = [i for i in range(n) if x.shape[i] != 1]
    if len(keep) <= 1:
        return x.reshape(out_shape)
    relabel = {old: new for new, old in enumerate(keep)}
    shp = [x.shape[i] for i in keep]
    q = [relabel[d] for d in dims if x.shape[d] != 1]

    # ---- Coalesce runs of axes adjacent in both input and output -------------
    groups_in_q_order = []
    for a in q:
        if groups_in_q_order and a == groups_in_q_order[-1][-1] + 1:
            groups_in_q_order[-1].append(a)
        else:
            groups_in_q_order.append([a])
    groups_sorted = sorted(groups_in_q_order, key=lambda g: g[0])
    gidx = {tuple(g): i for i, g in enumerate(groups_sorted)}
    s = [int(math.prod(shp[a] for a in g)) for g in groups_sorted]
    p = [gidx[tuple(g)] for g in groups_in_q_order]
    r = len(s)

    if r <= 1 or p == list(range(r)):
        # Pure metadata move (layout unchanged).
        return x.reshape(out_shape)

    # ---- Minimal "move axis to end" plan --------------------------------------
    # TODO(synk): add a dedicated copy-path (no in-kernel .T) for reduced perms
    # that keep the innermost axis fixed; they currently take two passes.
    j_star = 1
    while j_star < r and p[j_star] > p[j_star - 1]:
        j_star += 1
    moves = p[j_star:]

    cur = x.reshape(tuple(s))
    ro = list(range(r))  # reduced axis currently at each position
    for a in moves:
        pos = ro.index(a)
        if pos == len(ro) - 1:
            continue
        cshape = cur.shape
        A = int(math.prod(cshape[:pos]))
        M = int(cshape[pos])
        B = int(math.prod(cshape[pos + 1:]))
        y3 = _batched_minor_transpose(cur.reshape(A, M, B))
        cur = y3.reshape(cshape[:pos] + cshape[pos + 1:] + (M,))
        ro = ro[:pos] + ro[pos + 1:] + [a]

    return cur.reshape(out_shape)


if __name__ == "__main__":
    key = jax.random.PRNGKey(0)
    # NCHW-like input (batch=2, channels=4, spatial=16x16)
    x = jax.random.normal(key, (2, 4, 16, 16), dtype=jnp.float32)

    # 1) ONNX Transpose with no perm: reverse all dims -> (16, 16, 4, 2)
    y = jax.block_until_ready(transpose_pallas(x, perm=None))
    ref = jnp.transpose(x, (3, 2, 1, 0))
    assert y.shape == ref.shape and y.dtype == ref.dtype
    assert bool(jnp.array_equal(y, ref))

    # 2) Explicit permutation (NCHW -> NHWC): coalesces to a single pass.
    y2 = jax.block_until_ready(transpose_pallas(x, perm=(0, 2, 3, 1)))
    assert bool(jnp.array_equal(y2, jnp.transpose(x, (0, 2, 3, 1))))

    # 3) 3-D permutation (move batch to the end): single coalesced pass.
    x3 = jax.random.normal(jax.random.PRNGKey(2), (2, 4, 16), dtype=jnp.float32)
    y3 = jax.block_until_ready(transpose_pallas(x3, perm=(1, 2, 0)))
    assert bool(jnp.array_equal(y3, jnp.transpose(x3, (1, 2, 0))))

    # 4) onnx2pytorch identity quirk: len(dims)==2 and dims[0]==1 -> unchanged,
    #    both for an explicit (1, 0) perm and for the 2-D "no perm" default.
    w = jax.random.normal(jax.random.PRNGKey(1), (8, 32), dtype=jnp.float32)
    y4 = jax.block_until_ready(transpose_pallas(w, perm=(1, 0)))
    assert bool(jnp.array_equal(y4, w))
    y5 = jax.block_until_ready(transpose_pallas(w, perm=None))
    assert bool(jnp.array_equal(y5, w))

    print("KERNEL_OK")
</pallas_src>

<mosaic_0001>
module attributes {stable_mosaic.version = 11 : i64} {
  func.func @_minor_transpose_kernel(%arg0: i32, %arg1: i32, %arg2: i32, %arg3: memref<8x16x16xf32, #tpu.memory_space<vmem>>, %arg4: memref<8x16x16xf32, #tpu.memory_space<vmem>>) attributes {dimension_semantics = [#tpu.dimension_semantics<parallel>, #tpu.dimension_semantics<parallel>, #tpu.dimension_semantics<parallel>], iteration_bounds = array<i64: 1, 1, 1>, scalar_prefetch = 0 : i64, scratch_operands = 0 : i64, tpu.core_type = #tpu.core_type<tc>, window_params = [{transform_indices = @transform_0, window_bounds = array<i64: 8, 16, 16>}, {transform_indices = @transform_1, window_bounds = array<i64: 8, 16, 16>}]} {
    %c0 = arith.constant 0 : index
    %c0_0 = arith.constant 0 : index
    %c0_1 = arith.constant 0 : index
    %0 = vector.load %arg3[%c0, %c0_0, %c0_1] : memref<8x16x16xf32, #tpu.memory_space<vmem>>, vector<1x16x16xf32>
    %1 = vector.shape_cast %0 : vector<1x16x16xf32> to vector<16x16xf32>
    %2 = tpu.transpose %1, [1, 0] : vector<16x16xf32> -> vector<16x16xf32>
    %c0_2 = arith.constant 0 : index
    %c0_3 = arith.constant 0 : index
    %c0_4 = arith.constant 0 : index
    %3 = vector.load %arg4[%c0_2, %c0_3, %c0_4] : memref<8x16x16xf32, #tpu.memory_space<vmem>>, vector<1x16x16xf32>
    %4 = vector.shape_cast %3 : vector<1x16x16xf32> to vector<16x16xf32>
    %5 = vector.shape_cast %2 : vector<16x16xf32> to vector<1x16x16xf32>
    tpu.vector_store %arg4[%c0_2, %c0_3, %c0_4], %5 {strides = array<i32>} : memref<8x16x16xf32, #tpu.memory_space<vmem>>, vector<1x16x16xf32>,
    %c1 = arith.constant 1 : index
    %c0_5 = arith.constant 0 : index
    %c0_6 = arith.constant 0 : index
    %6 = vector.load %arg3[%c1, %c0_5, %c0_6] : memref<8x16x16xf32, #tpu.memory_space<vmem>>, vector<1x16x16xf32>
    %7 = vector.shape_cast %6 : vector<1x16x16xf32> to vector<16x16xf32>
    %8 = tpu.transpose %7, [1, 0] : vector<16x16xf32> -> vector<16x16xf32>
    %c1_7 = arith.constant 1 : index
    %c0_8 = arith.constant 0 : index
    %c0_9 = arith.constant 0 : index
    %9 = vector.load %arg4[%c1_7, %c0_8, %c0_9] : memref<8x16x16xf32, #tpu.memory_space<vmem>>, vector<1x16x16xf32>
    %10 = vector.shape_cast %9 : vector<1x16x16xf32> to vector<16x16xf32>
    %11 = vector.shape_cast %8 : vector<16x16xf32> to vector<1x16x16xf32>
    tpu.vector_store %arg4[%c1_7, %c0_8, %c0_9], %11 {strides = array<i32>} : memref<8x16x16xf32, #tpu.memory_space<vmem>>, vector<1x16x16xf32>,
    %c2 = arith.constant 2 : index
    %c0_10 = arith.constant 0 : index
    %c0_11 = arith.constant 0 : index
    %12 = vector.load %arg3[%c2, %c0_10, %c0_11] : memref<8x16x16xf32, #tpu.memory_space<vmem>>, vector<1x16x16xf32>
    %13 = vector.shape_cast %12 : vector<1x16x16xf32> to vector<16x16xf32>
    %14 = tpu.transpose %13, [1, 0] : vector<16x16xf32> -> vector<16x16xf32>
    %c2_12 = arith.constant 2 : index
    %c0_13 = arith.constant 0 : index
    %c0_14 = arith.constant 0 : index
    %15 = vector.load %arg4[%c2_12, %c0_13, %c0_14] : memref<8x16x16xf32, #tpu.memory_space<vmem>>, vector<1x16x16xf32>
    %16 = vector.shape_cast %15 : vector<1x16x16xf32> to vector<16x16xf32>
    %17 = vector.shape_cast %14 : vector<16x16xf32> to vector<1x16x16xf32>
    tpu.vector_store %arg4[%c2_12, %c0_13, %c0_14], %17 {strides = array<i32>} : memref<8x16x16xf32, #tpu.memory_space<vmem>>, vector<1x16x16xf32>,
    %c3 = arith.constant 3 : index
    %c0_15 = arith.constant 0 : index
    %c0_16 = arith.constant 0 : index
    %18 = vector.load %arg3[%c3, %c0_15, %c0_16] : memref<8x16x16xf32, #tpu.memory_space<vmem>>, vector<1x16x16xf32>
    %19 = vector.shape_cast %18 : vector<1x16x16xf32> to vector<16x16xf32>
    %20 = tpu.transpose %19, [1, 0] : vector<16x16xf32> -> vector<16x16xf32>
    %c3_17 = arith.constant 3 : index
    %c0_18 = arith.constant 0 : index
    %c0_19 = arith.constant 0 : index
    %21 = vector.load %arg4[%c3_17, %c0_18, %c0_19] : memref<8x16x16xf32, #tpu.memory_space<vmem>>, vector<1x16x16xf32>
    %22 = vector.shape_cast %21 : vector<1x16x16xf32> to vector<16x16xf32>
    %23 = vector.shape_cast %20 : vector<16x16xf32> to vector<1x16x16xf32>
    tpu.vector_store %arg4[%c3_17, %c0_18, %c0_19], %23 {strides = array<i32>} : memref<8x16x16xf32, #tpu.memory_space<vmem>>, vector<1x16x16xf32>,
    %c4 = arith.constant 4 : index
    %c0_20 = arith.constant 0 : index
    %c0_21 = arith.constant 0 : index
    %24 = vector.load %arg3[%c4, %c0_20, %c0_21] : memref<8x16x16xf32, #tpu.memory_space<vmem>>, vector<1x16x16xf32>
    %25 = vector.shape_cast %24 : vector<1x16x16xf32> to vector<16x16xf32>
    %26 = tpu.transpose %25, [1, 0] : vector<16x16xf32> -> vector<16x16xf32>
    %c4_22 = arith.constant 4 : index
    %c0_23 = arith.constant 0 : index
    %c0_24 = arith.constant 0 : index
    %27 = vector.load %arg4[%c4_22, %c0_23, %c0_24] : memref<8x16x16xf32, #tpu.memory_space<vmem>>, vector<1x16x16xf32>
    %28 = vector.shape_cast %27 : vector<1x16x16xf32> to vector<16x16xf32>
    %29 = vector.shape_cast %26 : vector<16x16xf32> to vector<1x16x16xf32>
    tpu.vector_store %arg4[%c4_22, %c0_23, %c0_24], %29 {strides = array<i32>} : memref<8x16x16xf32, #tpu.memory_space<vmem>>, vector<1x16x16xf32>,
    %c5 = arith.constant 5 : index
    %c0_25 = arith.constant 0 : index
    %c0_26 = arith.constant 0 : index
    %30 = vector.load %arg3[%c5, %c0_25, %c0_26] : memref<8x16x16xf32, #tpu.memory_space<vmem>>, vector<1x16x16xf32>
    %31 = vector.shape_cast %30 : vector<1x16x16xf32> to vector<16x16xf32>
    %32 = tpu.transpose %31, [1, 0] : vector<16x16xf32> -> vector<16x16xf32>
    %c5_27 = arith.constant 5 : index
    %c0_28 = arith.constant 0 : index
    %c0_29 = arith.constant 0 : index
    %33 = vector.load %arg4[%c5_27, %c0_28, %c0_29] : memref<8x16x16xf32, #tpu.memory_space<vmem>>, vector<1x16x16xf32>
    %34 = vector.shape_cast %33 : vector<1x16x16xf32> to vector<16x16xf32>
    %35 = vector.shape_cast %32 : vector<16x16xf32> to vector<1x16x16xf32>
    tpu.vector_store %arg4[%c5_27, %c0_28, %c0_29], %35 {strides = array<i32>} : memref<8x16x16xf32, #tpu.memory_space<vmem>>, vector<1x16x16xf32>,
    %c6 = arith.constant 6 : index
    %c0_30 = arith.constant 0 : index
    %c0_31 = arith.constant 0 : index
    %36 = vector.load %arg3[%c6, %c0_30, %c0_31] : memref<8x16x16xf32, #tpu.memory_space<vmem>>, vector<1x16x16xf32>
    %37 = vector.shape_cast %36 : vector<1x16x16xf32> to vector<16x16xf32>
    %38 = tpu.transpose %37, [1, 0] : vector<16x16xf32> -> vector<16x16xf32>
    %c6_32 = arith.constant 6 : index
    %c0_33 = arith.constant 0 : index
    %c0_34 = arith.constant 0 : index
    %39 = vector.load %arg4[%c6_32, %c0_33, %c0_34] : memref<8x16x16xf32, #tpu.memory_space<vmem>>, vector<1x16x16xf32>
    %40 = vector.shape_cast %39 : vector<1x16x16xf32> to vector<16x16xf32>
    %41 = vector.shape_cast %38 : vector<16x16xf32> to vector<1x16x16xf32>
    tpu.vector_store %arg4[%c6_32, %c0_33, %c0_34], %41 {strides = array<i32>} : memref<8x16x16xf32, #tpu.memory_space<vmem>>, vector<1x16x16xf32>,
    %c7 = arith.constant 7 : index
    %c0_35 = arith.constant 0 : index
    %c0_36 = arith.constant 0 : index
    %42 = vector.load %arg3[%c7, %c0_35, %c0_36] : memref<8x16x16xf32, #tpu.memory_space<vmem>>, vector<1x16x16xf32>
    %43 = vector.shape_cast %42 : vector<1x16x16xf32> to vector<16x16xf32>
    %44 = tpu.transpose %43, [1, 0] : vector<16x16xf32> -> vector<16x16xf32>
    %c7_37 = arith.constant 7 : index
    %c0_38 = arith.constant 0 : index
    %c0_39 = arith.constant 0 : index
    %45 = vector.load %arg4[%c7_37, %c0_38, %c0_39] : memref<8x16x16xf32, #tpu.memory_space<vmem>>, vector<1x16x16xf32>
    %46 = vector.shape_cast %45 : vector<1x16x16xf32> to vector<16x16xf32>
    %47 = vector.shape_cast %44 : vector<16x16xf32> to vector<1x16x16xf32>
    tpu.vector_store %arg4[%c7_37, %c0_38, %c0_39], %47 {strides = array<i32>} : memref<8x16x16xf32, #tpu.memory_space<vmem>>, vector<1x16x16xf32>,
    return
  }
  func.func @transform_0(%arg0: i32, %arg1: i32, %arg2: i32) -> (i32, i32, i32) {
    %c0_i32 = arith.constant 0 : i32
    return %arg0, %arg1, %arg2 : i32, i32, i32
  }
  func.func @transform_1(%arg0: i32, %arg1: i32, %arg2: i32) -> (i32, i32, i32) {
    %c0_i32 = arith.constant 0 : i32
    return %arg0, %arg2, %arg1 : i32, i32, i32
  }
}

</mosaic_0001>

<bundles_post_ra>
// kernel: tpu_custom_call.1
= control target key start
LH: loop header
LB: loop body
LE: loop exit
PB: predicated region body
PF: predicated region fallthrough
CT: control target
= control target key end

     0   :  { %6 = vsyncpa [#allocation3], 0  ;;  %s456_s0 = inlined_call_operand.hbm [shape: f32[8,16,16], index: 0, kind: input, shape index: {}]   ;;  %s457_s1 = inlined_call_operand.hbm [shape: f32[8,16,16], index: 1, kind: output, shape index: {}]  }
   0x1   :  { %7 = vsyncpa [#allocation4], 0  ;;  %s396_s6 = smov [#allocation2]   ;;  %s348_s10 = scalar_lea.hbm %s456_s0, 2048 }
   0x2   :  { %s13_s7 = sshll.u32 %s396_s6, 4  ;;  %p349_p0 = scmp.ne.s32.totalorder %s456_s0, %s348_s10  ;;  %s14_s7 = int_to_ptr.vmem [resolvable:$true] %s13_s7 }
   0x3   :  { %p352_p1 = scmp.lt.u32.totalorder %s348_s10, %s456_s0 }
   0x5   :  { %p354_p2 = pnand %p352_p1, %p349_p0 }
   0x7   :  { %357 = shalt.err (!%p354_p2)
}
   0x8   :  { %s358_s15 = scalar_lea.vmem %s14_s7, 2048  ;;  %p363_p4 = scmp.lt.s32.totalorder %s14_s7, %s14_s7 }
   0x9   :  { %p359_p3 = scmp.ne.s32.totalorder %s14_s7, %s358_s15  ;;  %p364_p5 = scmp.lt.s32.totalorder %s358_s15, %s358_s15 }
   0xb   :  { %p365_p6 = por %p364_p5, %p363_p4 }
   0xd   :  { %p366_p7 = pnand %p365_p6, %p359_p3 }
   0xf   :  { %369 = shalt.err (!%p366_p7)
}
  0x10   :  { %s397_s16 = smov 128   ;;  %s398_s17 = smov 8  }
  0x11   :  { %19 = dma.hbm_to_vmem [thread:$0]  %s456_s0, 2048, %s14_s7, [#allocation3], %s397_s16, %s397_s16, %s398_s17  }
  0x12   :  { %392 = dma.done.wait [#allocation3], 2048  }
  0x13   :  { %393 = vsyncadd [#allocation3], 4294965248  ;;  %v61_v0 = vld [vmem:[#allocation2 + $0x10] sm:$0xff]  ;;  %v23_v1 = vld [vmem:[#allocation2] sm:$0xff]  ;;  %vm57_vm0 = vcmask 130048   ;;  %s399_s0 = smov [#allocation5]  }
  0x14   :  { %63 = vxpose.xlu1.b32.start [1/2] (short) (narrow) %v61_v0, 16  ;;  %25 = vxpose.xlu0.b32.start [1/2] (short) (narrow) %v23_v1, 16  ;;  %v62_v2 = vld [vmem:[#allocation2 + $0x18] sm:$0xff]  ;;  %v24_v3 = vld [vmem:[#allocation2 + $0x8] sm:$0xff]  ;;  %v137_v4 = vld [vmem:[#allocation2 + $0x30] sm:$0xff]  ;;  %s331_s20 = sshll.u32 %s399_s0, 4  ;;  %s332_s20 = int_to_ptr.vmem [resolvable:$true] %s331_s20 }
  0x15   :  { %v99_v5 = vld [vmem:[#allocation2 + $0x20] sm:$0xff]  ;;  %v138_v6 = vld [vmem:[#allocation2 + $0x38] sm:$0xff]  ;;  %v100_v7 = vld [vmem:[#allocation2 + $0x28] sm:$0xff]  ;;  %s370_s21 = scalar_lea.vmem %s332_s20, 2048  ;;  %p375_p9 = scmp.lt.s32.totalorder %s332_s20, %s332_s20 }
  0x16   :  { %v213_v8 = vld [vmem:[#allocation2 + $0x50] sm:$0xff]  ;;  %v175_v9 = vld [vmem:[#allocation2 + $0x40] sm:$0xff]  ;;  %v214_v10 = vld [vmem:[#allocation2 + $0x58] sm:$0xff]  ;;  %p371_p8 = scmp.ne.s32.totalorder %s332_s20, %s370_s21  ;;  %p376_p10 = scmp.lt.s32.totalorder %s370_s21, %s370_s21 }
  0x17   :  { %v176_v11 = vld [vmem:[#allocation2 + $0x48] sm:$0xff]  ;;  %v289_v12 = vld [vmem:[#allocation2 + $0x70] sm:$0xff]  ;;  %v251_v13 = vld [vmem:[#allocation2 + $0x60] sm:$0xff] }
  0x18   :  { %64 = vxpose.xlu1.b32.end [2/2] (short) (narrow) %v62_v2, 16  ;;  %26 = vxpose.xlu0.b32.end [2/2] (short) (narrow) %v24_v3, 16  ;;  %v290_v14 = vld [vmem:[#allocation2 + $0x78] sm:$0xff]  ;;  %v252_v15 = vld [vmem:[#allocation2 + $0x68] sm:$0xff]  ;;  %p377_p11 = por %p376_p10, %p375_p9 }
  0x1a   :  { %p378_p12 = pnand %p377_p11, %p371_p8 }
  0x1c   :  { %139 = vxpose.xlu1.b32.start [1/2] (short) (narrow) %v137_v4, 16  ;;  %101 = vxpose.xlu0.b32.start [1/2] (short) (narrow) %v99_v5, 16 }
  0x20   :  { %140 = vxpose.xlu1.b32.end [2/2] (short) (narrow) %v138_v6, 16  ;;  %102 = vxpose.xlu0.b32.end [2/2] (short) (narrow) %v100_v7, 16 }
  0x24   :  { %215 = vxpose.xlu1.b32.start [1/2] (short) (narrow) %v213_v8, 16  ;;  %177 = vxpose.xlu0.b32.start [1/2] (short) (narrow) %v175_v9, 16 }
  0x28   :  { %216 = vxpose.xlu1.b32.end [2/2] (short) (narrow) %v214_v10, 16  ;;  %178 = vxpose.xlu0.b32.end [2/2] (short) (narrow) %v176_v11, 16 }
  0x2c   :  { %291 = vxpose.xlu1.b32.start [1/2] (short) (narrow) %v289_v12, 16  ;;  %253 = vxpose.xlu0.b32.start [1/2] (short) (narrow) %v251_v13, 16 }
  0x30   :  { %292 = vxpose.xlu1.b32.end [2/2] (short) (narrow) %v290_v14, 16  ;;  %254 = vxpose.xlu0.b32.end [2/2] (short) (narrow) %v252_v15, 16 }
  0x94   :  { %v79_v16 = vpop.trf.xlu1  ;;  %v41_v17 = vpop.trf.xlu0 }
  0x95   :  { %96 = vst.msk [vmem:[#allocation5 + $0x10] sm:$0xff] %vm57_vm0, %v79_v16  ;;  %58 = vst.msk [vmem:[#allocation5] sm:$0xff] %vm57_vm0, %v41_v17 }
  0x98   :  { %v80_v18 = vpop.trf.xlu1  ;;  %v42_v19 = vpop.trf.xlu0 }
  0x99   :  { %97 = vst.msk [vmem:[#allocation5 + $0x18] sm:$0xff] %vm57_vm0, %v80_v18  ;;  %59 = vst.msk [vmem:[#allocation5 + $0x8] sm:$0xff] %vm57_vm0, %v42_v19 }
  0x9c   :  { %v155_v20 = vpop.trf.xlu1  ;;  %v117_v21 = vpop.trf.xlu0 }
  0x9d   :  { %172 = vst.msk [vmem:[#allocation5 + $0x30] sm:$0xff] %vm57_vm0, %v155_v20  ;;  %134 = vst.msk [vmem:[#allocation5 + $0x20] sm:$0xff] %vm57_vm0, %v117_v21 }
  0xa0   :  { %v156_v22 = vpop.trf.xlu1  ;;  %v118_v23 = vpop.trf.xlu0 }
  0xa1   :  { %173 = vst.msk [vmem:[#allocation5 + $0x38] sm:$0xff] %vm57_vm0, %v156_v22  ;;  %135 = vst.msk [vmem:[#allocation5 + $0x28] sm:$0xff] %vm57_vm0, %v118_v23 }
  0xa4   :  { %v231_v24 = vpop.trf.xlu1  ;;  %v193_v25 = vpop.trf.xlu0 }
  0xa5   :  { %248 = vst.msk [vmem:[#allocation5 + $0x50] sm:$0xff] %vm57_vm0, %v231_v24  ;;  %210 = vst.msk [vmem:[#allocation5 + $0x40] sm:$0xff] %vm57_vm0, %v193_v25 }
  0xa8   :  { %v232_v26 = vpop.trf.xlu1  ;;  %v194_v27 = vpop.trf.xlu0 }
  0xa9   :  { %249 = vst.msk [vmem:[#allocation5 + $0x58] sm:$0xff] %vm57_vm0, %v232_v26  ;;  %211 = vst.msk [vmem:[#allocation5 + $0x48] sm:$0xff] %vm57_vm0, %v194_v27 }
  0xac   :  { %v307_v28 = vpop.trf.xlu1  ;;  %v269_v29 = vpop.trf.xlu0 }
  0xad   :  { %324 = vst.msk [vmem:[#allocation5 + $0x70] sm:$0xff] %vm57_vm0, %v307_v28  ;;  %286 = vst.msk [vmem:[#allocation5 + $0x60] sm:$0xff] %vm57_vm0, %v269_v29 }
  0xb0   :  { %v308_v30 = vpop.trf.xlu1  ;;  %v270_v31 = vpop.trf.xlu0 }
  0xb1   :  { %325 = vst.msk [vmem:[#allocation5 + $0x78] sm:$0xff] %vm57_vm0, %v308_v30  ;;  %287 = vst.msk [vmem:[#allocation5 + $0x68] sm:$0xff] %vm57_vm0, %v270_v31 }
  0xb2   :  { %381 = shalt.err (!%p378_p12)
}
  0xb3   :  { %s382_s24 = scalar_lea.hbm %s457_s1, 2048 }
  0xb4   :  { %p383_p13 = scmp.ne.s32.totalorder %s457_s1, %s382_s24  ;;  %p386_p0 = scmp.lt.u32.totalorder %s382_s24, %s457_s1 }
  0xb6   :  { %p388_p1 = pnand %p386_p0, %p383_p13 }
  0xb8   :  { %391 = shalt.err (!%p388_p1)
}
  0xb9   :  { %337 = dma.vmem_to_hbm [thread:$0]  %s332_s20, 2048, %s457_s1, [#allocation4], %s397_s16, %s397_s16, %s398_s17  }
  0xba   :  { %394 = dma.done.wait [#allocation4], 2048  }
  0xbb   :  { %395 = vsyncadd [#allocation4], 4294965248 }
  0xbc   :  { %341 = vsyncpa [#allocation3], 1 }
  0xbd   :  { %342 = vsyncpa [#allocation4], 1 }

</bundles_post_ra>
